<compile_context>
chip_gen: v5e
topology: v5e:2x2
jax: 0.10.0
libtpu: 0.0.40
codegen_flags: <defaults>
</compile_context>

<pallas_src>
import numpy as np
import jax
import jax.numpy as jnp
from jax.experimental import pallas as pl
from jax.experimental.pallas import tpu as pltpu


# ----------------------------------------------------------------------------
# (S, S) matrix equal to avg_pool1d(count_include_pad=True) + compute_fix_avgpool_scaler:
#   out[i] = sum_{j: |i-j|<=pad, 0<=j<S} x[j] / count[i]
#   count[i] = min(S, min(kernel, pad + 1 + min(i, S-1-i)))
# ----------------------------------------------------------------------------
def make_window_mean_matrix(seq_len, kernel_size, padding_size):
    assert kernel_size == 2 * padding_size + 1
    idx = np.arange(seq_len)
    count = np.minimum(
        seq_len,
        np.minimum(kernel_size, padding_size + 1 + np.minimum(idx, seq_len - 1 - idx)),
    ).astype(np.float32)
    in_window = np.abs(idx[:, None] - idx[None, :]) <= padding_size
    return (in_window.astype(np.float32) / count[:, None]).astype(np.float32)


def _analyze_windows(seq_len, windows, weights):
    """Trace-time branch analysis.

    * Branches whose window matrix has ALL rows identical (window fully overlaps
      the sequence) are 'global' branches: A@x is the sequence mean broadcast to
      every row, so the max is trivial.  Their weights are summed.
    * Remaining ('windowed') branches are deduplicated; identical matrices fold
      their weights.  Exact because all branches share the same MLP weights.
    """
    win_mats, win_wts, global_wt = [], [], 0.0
    for (ker, pad), w in zip(windows, weights):
        a = make_window_mean_matrix(seq_len, ker, pad)
        if np.all(a == a[0:1, :]):          # rank-1: every row == global mean row
            global_wt += float(w)
            continue
        for i, u in enumerate(win_mats):
            if np.array_equal(a, u):
                win_wts[i] += float(w)
                break
        else:
            win_mats.append(a)
            win_wts.append(float(w))
    return win_mats, win_wts, global_wt


# ----------------------------------------------------------------------------
# Kernel factory.  All branch structure (n_win, weights, Bt, ...) is static.
# Note: branch weights are baked in as closure constants -> changing them
# recompiles (intentional; they come from the module definition, not data).
# ----------------------------------------------------------------------------
def _make_kernel(n_win, win_weights, global_weight, bt, S, compute_dtype):
    assert n_win > 0 or global_weight != 0.0

    def _sigmoid(z):
        return 1.0 / (1.0 + jnp.exp(-z))

    def kernel(*refs):
        if n_win > 0:
            x_ref, a_ref, w1_ref, b1_ref, w23_ref, b23_ref, o_ref = refs
        else:
            x_ref, w1_ref, b1_ref, w23_ref, b23_ref, o_ref = refs

        xt = x_ref[0]                       # (S, bt*D)   compute_dtype
        b1 = b1_ref[...]                    # (1, bt*H)   f32 (tiled per batch)
        w23 = w23_ref[...]                  # (bt*H, bt)  compute_dtype (block-diag)
        b23 = b23_ref[0, 0]                 # scalar f32 from SMEM

        res = jnp.zeros((1, bt), jnp.float32)
        h = None

        if n_win > 0:
            # (1) hidden projection, lane-dense in batch: (S, bt*D) @ (bt*D, bt*H)
            h = jnp.dot(xt, w1_ref[...], preferred_element_type=jnp.float32)
            # (2) ALL windowed means in one MXU matmul: (n_win*S, S) @ (S, bt*H);
            #     b1 added after (exact, since A@(xW1)+b1 == (A@x)W1+b1).
            m = jnp.dot(a_ref[...], h.astype(compute_dtype),
                        preferred_element_type=jnp.float32) + b1
            m = jnp.maximum(m, 0.01 * m)    # LeakyReLU(0.01)
            # (3) folded layer2@layer3 tail, per-batch block-diag -> (n_win*S, bt)
            t = jnp.dot(m.astype(compute_dtype), w23,
                        preferred_element_type=jnp.float32)
            # (4) per-branch max over the S rows (lane-dense, batch on lanes),
            #     then bias + sigmoid (monotone => sigmoid(max+c) == max(sigmoid(.+c)))
            for k in range(n_win):          # static, tiny
                tk = jnp.max(t[k * S:(k + 1) * S, :], axis=0, keepdims=True)  # (1, bt)
                res = res + win_weights[k] * _sigmoid(tk + b23)

        if global_weight != 0.0:
            # Fully-overlapping window(s): A@x == broadcast sequence mean, so the
            # whole branch collapses to mean -> MLP -> sigmoid (no SxS matmul, no max).
            if h is not None:
                hg = jnp.mean(h, axis=0, keepdims=True)                        # (1, bt*H)
            else:
                xg = jnp.mean(xt.astype(jnp.float32), axis=0, keepdims=True)   # (1, bt*D)
                hg = jnp.dot(xg.astype(compute_dtype), w1_ref[...],
                             preferred_element_type=jnp.float32)               # (1, bt*H)
            mg = hg + b1
            mg = jnp.maximum(mg, 0.01 * mg)
            tg = jnp.dot(mg.astype(compute_dtype), w23,
                         preferred_element_type=jnp.float32)                   # (1, bt)
            res = res + global_weight * _sigmoid(tg + b23)

        o_ref[...] = res.reshape(1, 1, bt)

    return kernel


def _default_bt(B, S, D, itemsize):
    """Target ~128 KiB of x per grid step, but keep >= 2 grid steps when possible
    so v7x's two TensorCores both get work."""
    target = max(1, (128 * 1024) // max(1, S * D * itemsize))
    bt = max(1, min(B, target))
    while bt > 1 and (B + bt - 1) // bt < 2:
        bt //= 2
    return max(1, bt)


def sliding_windows_forward(x, windows, branch_weights, w1, b1, w2, b2, w3, b3,
                            *, bt=None, compute_dtype=jnp.bfloat16):
    """Weighted sum of slide_net branches:  sum_k w_k * max_s sigmoid(MLP(A_k @ x))."""
    B, S, D = x.shape
    Hdim = w1.shape[1]

    win_mats, win_wts, global_wt = _analyze_windows(S, windows, branch_weights)
    n_win = len(win_mats)

    itemsize = jnp.dtype(compute_dtype).itemsize
    if bt is None:
        bt = _default_bt(B, S, D, itemsize)
    bt = max(1, min(int(bt), B))
    B_pad = ((B + bt - 1) // bt) * bt
    G = B_pad // bt

    # ---- wrapper-side layout plumbing (lane-dense batch packing) ----
    xp = x.astype(jnp.float32)
    if B_pad != B:
        xp = jnp.pad(xp, ((0, B_pad - B), (0, 0), (0, 0)))
    # (B_pad, S, D) -> (G, S, bt*D): batch j of group g sits in lanes [j*D, (j+1)*D)
    xt = xp.reshape(G, bt, S, D).transpose(0, 2, 1, 3).reshape(G, S, bt * D)
    xt = xt.astype(compute_dtype)

    eye = jnp.eye(bt, dtype=jnp.float32)
    w1_bd = jnp.kron(eye, w1.astype(jnp.float32)).astype(compute_dtype)     # (bt*D, bt*H)
    w23 = (w2.astype(jnp.float32) @ w3.astype(jnp.float32))                 # (H, 1)
    w23_bd = jnp.kron(eye, w23).astype(compute_dtype)                       # (bt*H, bt)
    b1_t = jnp.tile(b1.astype(jnp.float32).reshape(1, Hdim), (1, bt))       # (1, bt*H)
    b23 = (b2.astype(jnp.float32) @ w3.astype(jnp.float32)
           + b3.astype(jnp.float32)).reshape(1, 1)                          # SMEM scalar

    args = [xt]
    in_specs = [pl.BlockSpec((1, S, bt * D), lambda g: (g, 0, 0))]
    if n_win > 0:
        a_stack = jnp.asarray(np.concatenate(win_mats, axis=0)).astype(compute_dtype)
        args.append(a_stack)
        in_specs.append(pl.BlockSpec((n_win * S, S), lambda g: (0, 0)))
    args += [w1_bd, b1_t, w23_bd, b23]
    in_specs += [
        pl.BlockSpec((bt * D, bt * Hdim), lambda g: (0, 0)),
        pl.BlockSpec((1, bt * Hdim), lambda g: (0, 0)),
        pl.BlockSpec((bt * Hdim, bt), lambda g: (0, 0)),
        pl.BlockSpec(memory_space=pltpu.MemorySpace.SMEM),
    ]

    kern = _make_kernel(n_win, tuple(win_wts), float(global_wt), bt, S, compute_dtype)

    # Explicit VMEM budget (double-buffered blocks + f32 intermediates), clamped so
    # it also fits v7x's 64 MiB physical VMEM.
    est = 2 * (S * bt * D * itemsize
               + n_win * S * S * itemsize
               + (bt * D) * (bt * Hdim) * itemsize
               + (bt * Hdim) * bt * itemsize
               + bt * Hdim * 4 + bt * 4) \
        + (n_win + 1) * S * bt * Hdim * 4
    vmem_limit = int(min(48 * 1024 * 1024, max(4 * 1024 * 1024, 4 * est)))

    out = pl.pallas_call(
        kern,
        out_shape=jax.ShapeDtypeStruct((G, 1, bt), jnp.float32),
        grid=(G,),
        in_specs=in_specs,
        out_specs=pl.BlockSpec((1, 1, bt), lambda g: (g, 0, 0)),
        compiler_params=pltpu.CompilerParams(
            dimension_semantics=("parallel",),
            vmem_limit_bytes=vmem_limit),
    )(*args)

    return out.reshape(B_pad)[:B]          # (B,), like torch's .squeeze()


def sliding_nn_forward(x, w1, b1, w2, b2, w3, b3, **kw):
    """sliding_nn.forward: (slide(33,16) + slide(129,64) + slide(257,128)) / 3."""
    return sliding_windows_forward(
        x, [(33, 16), (129, 64), (257, 128)], [1.0 / 3.0] * 3,
        w1, b1, w2, b2, w3, b3, **kw)


def sliding_nn_fixed_forward(x, w1, b1, w2, b2, w3, b3, win_size=513, **kw):
    """sliding_nn_fixed.forward(x, win_size=513, scale=True)."""
    pad = (win_size - 1) // 2
    return sliding_windows_forward(
        x, [(win_size, pad)], [1.0], w1, b1, w2, b2, w3, b3, **kw)


# ----------------------------------------------------------------------------
# Pure-JAX reference that mirrors the torch computation DIRECTLY (padded sliding
# sum emulating F.avg_pool1d(count_include_pad=True), then the fix scaler, MLP,
# sigmoid, max) — independent of the kernel's window-matrix algebra.
# ----------------------------------------------------------------------------
def reference_forward(x, windows, weights, w1, b1, w2, b2, w3, b3):
    B, S, D = x.shape
    total = jnp.zeros((B,), jnp.float32)
    for (ker, pad), wgt in zip(windows, weights):
        assert ker == 2 * pad + 1
        xp = jnp.pad(x, ((0, 0), (pad, pad), (0, 0)))
        csum = jnp.concatenate(
            [jnp.zeros((B, 1, D), x.dtype), jnp.cumsum(xp, axis=1)], axis=1)
        win_sum = csum[:, ker:, :] - csum[:, :-ker, :]          # (B, S, D)
        xm = win_sum / float(ker)                               # avg_pool1d (incl. pad)
        scaler = np.array(
            [ker / min(S, min(ker, pad + 1 + min(i, S - i - 1))) for i in range(S)],
            dtype=np.float32)                                   # compute_fix_avgpool_scaler
        xm = xm * scaler[None, :, None]
        h1 = xm @ w1 + b1
        h1 = jnp.where(h1 >= 0.0, h1, 0.01 * h1)                # LeakyReLU(0.01)
        h3 = (h1 @ w2 + b2) @ w3 + b3
        o = 1.0 / (1.0 + jnp.exp(-h3))                          # (B, S, 1)
        total = total + wgt * jnp.max(o, axis=1)[:, 0]
    return total


if __name__ == "__main__":
    B, S, D = 4, 64, 32   # batch, seq_len, feature dim (the `dim` passed to the module)

    key = jax.random.PRNGKey(0)
    k_x, k1, k2, k3, kb1, kb2, kb3 = jax.random.split(key, 7)

    x = jax.random.normal(k_x, (B, S, D), dtype=jnp.float32)

    # Parameters stored as (in, out) so the kernel computes x @ W (== torch x @ W.T).
    w1 = jax.random.normal(k1, (D, 20), dtype=jnp.float32) * np.sqrt(2.0 / D)
    b1 = jax.random.normal(kb1, (1, 20), dtype=jnp.float32) * 0.1
    w2 = jax.random.normal(k2, (20, 5), dtype=jnp.float32) * np.sqrt(2.0 / 20)
    b2 = jax.random.normal(kb2, (1, 5), dtype=jnp.float32) * 0.1
    w3 = jax.random.normal(k3, (5, 1), dtype=jnp.float32) * np.sqrt(2.0 / 5)
    b3 = jax.random.normal(kb3, (1, 1), dtype=jnp.float32) * 0.1

    # --- sliding_nn_fixed.forward (win_size=513, scale=True) ----------------
    windows_fix = [(513, 256)]
    ref_fix = jax.block_until_ready(
        reference_forward(x, windows_fix, [1.0], w1, b1, w2, b2, w3, b3))
    out_fix_f32 = jax.block_until_ready(
        sliding_nn_fixed_forward(x, w1, b1, w2, b2, w3, b3, win_size=513,
                                 compute_dtype=jnp.float32))
    assert out_fix_f32.shape == (B,)
    np.testing.assert_allclose(np.asarray(out_fix_f32), np.asarray(ref_fix),
                               rtol=5e-4, atol=1e-5)
    out_fix_bf16 = jax.block_until_ready(
        sliding_nn_fixed_forward(x, w1, b1, w2, b2, w3, b3, win_size=513))
    np.testing.assert_allclose(np.asarray(out_fix_bf16), np.asarray(ref_fix),
                               rtol=3e-2, atol=1e-2)

    # --- sliding_nn.forward (three branches averaged) -----------------------
    windows3 = [(33, 16), (129, 64), (257, 128)]
    ref3 = jax.block_until_ready(
        reference_forward(x, windows3, [1.0 / 3.0] * 3, w1, b1, w2, b2, w3, b3))
    out3_f32 = jax.block_until_ready(
        sliding_nn_forward(x, w1, b1, w2, b2, w3, b3, compute_dtype=jnp.float32))
    assert out3_f32.shape == (B,)
    np.testing.assert_allclose(np.asarray(out3_f32), np.asarray(ref3),
                               rtol=5e-4, atol=1e-5)
    out3_bf16 = jax.block_until_ready(
        sliding_nn_forward(x, w1, b1, w2, b2, w3, b3))
    np.testing.assert_allclose(np.asarray(out3_bf16), np.asarray(ref3),
                               rtol=3e-2, atol=1e-2)

    print("KERNEL_OK")
</pallas_src>

<mosaic_0001>
module attributes {stable_mosaic.version = 11 : i64} {
  func.func @kernel(%arg0: i32, %arg1: memref<1x64x64xf32, #tpu.memory_space<vmem>>, %arg2: memref<64x40xf32, #tpu.memory_space<vmem>>, %arg3: memref<1x40xf32, #tpu.memory_space<vmem>>, %arg4: memref<40x2xf32, #tpu.memory_space<vmem>>, %arg5: memref<1x1xf32, #tpu.memory_space<smem>>, %arg6: memref<1x1x2xf32, #tpu.memory_space<vmem>>) attributes {dimension_semantics = [#tpu.dimension_semantics<parallel>], iteration_bounds = array<i64: 2>, scalar_prefetch = 0 : i64, scratch_operands = 0 : i64, tpu.core_type = #tpu.core_type<tc>, window_params = [{transform_indices = @transform_0, window_bounds = array<i64: 1, 64, 64>}, {pipeline_mode = #tpu.pipeline_mode<synchronous>, transform_indices = @transform_1, window_bounds = array<i64: 64, 40>}, {pipeline_mode = #tpu.pipeline_mode<synchronous>, transform_indices = @transform_2, window_bounds = array<i64: 1, 40>}, {pipeline_mode = #tpu.pipeline_mode<synchronous>, transform_indices = @transform_3, window_bounds = array<i64: 40, 2>}, {transform_indices = @transform_4, window_bounds = array<i64: 1, 1>}, {transform_indices = @transform_5, window_bounds = array<i64: 1, 1, 2>}]} {
    %c0 = arith.constant 0 : index
    %c0_0 = arith.constant 0 : index
    %c0_1 = arith.constant 0 : index
    %0 = vector.load %arg1[%c0, %c0_0, %c0_1] : memref<1x64x64xf32, #tpu.memory_space<vmem>>, vector<1x64x64xf32>
    %1 = vector.shape_cast %0 : vector<1x64x64xf32> to vector<64x64xf32>
    %c0_2 = arith.constant 0 : index
    %c0_3 = arith.constant 0 : index
    %2 = vector.load %arg3[%c0_2, %c0_3] : memref<1x40xf32, #tpu.memory_space<vmem>>, vector<1x40xf32>
    %c0_4 = arith.constant 0 : index
    %c0_5 = arith.constant 0 : index
    %3 = vector.load %arg4[%c0_4, %c0_5] : memref<40x2xf32, #tpu.memory_space<vmem>>, vector<40x2xf32>
    %c0_6 = arith.constant 0 : index
    %c0_7 = arith.constant 0 : index
    %4 = memref.load %arg5[%c0_6, %c0_7] : memref<1x1xf32, #tpu.memory_space<smem>>
    %cst = arith.constant 0.000000e+00 : f32
    %5 = vector.broadcast %cst : f32 to vector<1x2xf32>
    %cst_8 = arith.constant dense<0.000000e+00> : vector<64xf32>
    %6 = vector.multi_reduction <add>, %1, %cst_8 [0] : vector<64x64xf32> to vector<64xf32>
    %7 = vector.shape_cast %6 : vector<64xf32> to vector<1x64xf32>
    %cst_9 = arith.constant 6.400000e+01 : f32
    %8 = vector.broadcast %cst_9 : f32 to vector<1x64xf32>
    %9 = arith.divf %7, %8 : vector<1x64xf32>
    %c0_10 = arith.constant 0 : index
    %c0_11 = arith.constant 0 : index
    %10 = vector.load %arg2[%c0_10, %c0_11] : memref<64x40xf32, #tpu.memory_space<vmem>>, vector<64x40xf32>
    %cst_12 = arith.constant dense<0.000000e+00> : vector<1x40xf32>
    %11 = tpu.matmul %9, %10, %cst_12 {dimension_numbers = #tpu.dot_dimension_numbers<[1], [0], [0], [1], [0, 0, 1, 1], [], []>} : vector<1x64xf32>, vector<64x40xf32>, vector<1x40xf32> -> vector<1x40xf32>
    %12 = arith.addf %11, %2 : vector<1x40xf32>
    %cst_13 = arith.constant 0.00999999977 : f32
    %13 = vector.broadcast %cst_13 : f32 to vector<1x40xf32>
    %14 = arith.mulf %13, %12 : vector<1x40xf32>
    %15 = arith.maximumf %12, %14 : vector<1x40xf32>
    %cst_14 = arith.constant dense<0.000000e+00> : vector<1x2xf32>
    %16 = tpu.matmul %15, %3, %cst_14 {dimension_numbers = #tpu.dot_dimension_numbers<[1], [0], [0], [1], [0, 0, 1, 1], [], []>} : vector<1x40xf32>, vector<40x2xf32>, vector<1x2xf32> -> vector<1x2xf32>
    %17 = vector.broadcast %4 : f32 to vector<1x2xf32>
    %18 = arith.addf %16, %17 : vector<1x2xf32>
    %cst_15 = arith.constant 0.000000e+00 : f32
    %19 = vector.broadcast %cst_15 : f32 to vector<1x2xf32>
    %20 = arith.subf %19, %18 : vector<1x2xf32>
    %21 = math.exp %20 : vector<1x2xf32>
    %cst_16 = arith.constant 1.000000e+00 : f32
    %22 = vector.broadcast %cst_16 : f32 to vector<1x2xf32>
    %23 = arith.addf %22, %21 : vector<1x2xf32>
    %cst_17 = arith.constant 1.000000e+00 : f32
    %24 = vector.broadcast %cst_17 : f32 to vector<1x2xf32>
    %25 = arith.divf %24, %23 : vector<1x2xf32>
    %cst_18 = arith.constant 1.000000e+00 : f32
    %26 = vector.broadcast %cst_18 : f32 to vector<1x2xf32>
    %27 = arith.mulf %26, %25 : vector<1x2xf32>
    %28 = arith.addf %5, %27 : vector<1x2xf32>
    %29 = vector.shape_cast %28 : vector<1x2xf32> to vector<1x1x2xf32>
    %c0_19 = arith.constant 0 : index
    %c0_20 = arith.constant 0 : index
    %c0_21 = arith.constant 0 : index
    %30 = vector.load %arg6[%c0_19, %c0_20, %c0_21] : memref<1x1x2xf32, #tpu.memory_space<vmem>>, vector<1x1x2xf32>
    tpu.vector_store %arg6[%c0_19, %c0_20, %c0_21], %29 {strides = array<i32>} : memref<1x1x2xf32, #tpu.memory_space<vmem>>, vector<1x1x2xf32>,
    return
  }
  func.func @transform_0(%arg0: i32) -> (i32, i32, i32) {
    %c0_i32 = arith.constant 0 : i32
    %c0_i32_0 = arith.constant 0 : i32
    %c0_i32_1 = arith.constant 0 : i32
    return %arg0, %c0_i32, %c0_i32_0 : i32, i32, i32
  }
  func.func @transform_1(%arg0: i32) -> (i32, i32) {
    %c0_i32 = arith.constant 0 : i32
    %c0_i32_0 = arith.constant 0 : i32
    %c0_i32_1 = arith.constant 0 : i32
    return %c0_i32, %c0_i32_0 : i32, i32
  }
  func.func @transform_2(%arg0: i32) -> (i32, i32) {
    %c0_i32 = arith.constant 0 : i32
    %c0_i32_0 = arith.constant 0 : i32
    %c0_i32_1 = arith.constant 0 : i32
    return %c0_i32, %c0_i32_0 : i32, i32
  }
  func.func @transform_3(%arg0: i32) -> (i32, i32) {
    %c0_i32 = arith.constant 0 : i32
    %c0_i32_0 = arith.constant 0 : i32
    %c0_i32_1 = arith.constant 0 : i32
    return %c0_i32, %c0_i32_0 : i32, i32
  }
  func.func @transform_4(%arg0: i32) -> (i32, i32) {
    %c0_i32 = arith.constant 0 : i32
    %c0_i32_0 = arith.constant 0 : i32
    %c0_i32_1 = arith.constant 0 : i32
    return %c0_i32, %c0_i32_0 : i32, i32
  }
  func.func @transform_5(%arg0: i32) -> (i32, i32, i32) {
    %c0_i32 = arith.constant 0 : i32
    %c0_i32_0 = arith.constant 0 : i32
    %c0_i32_1 = arith.constant 0 : i32
    return %arg0, %c0_i32, %c0_i32_0 : i32, i32, i32
  }
}

</mosaic_0001>

<bundles_post_ra>
// kernel: tpu_custom_call.1
= control target key start
LH: loop header
LB: loop body
LE: loop exit
PB: predicated region body
PF: predicated region fallthrough
CT: control target
= control target key end

     0   :  { %s840_s0 = inlined_call_operand.hbm [shape: f32[2,64,64], index: 0, kind: input, shape index: {}]   ;;  %s841_s1 = inlined_call_operand.vmem [shape: f32[64,40], index: 1, kind: input, shape index: {}]   ;;  %s842_s2 = inlined_call_operand.vmem [shape: f32[1,40], index: 2, kind: input, shape index: {}]   ;;  %s843_s3 = inlined_call_operand.vmem [shape: f32[40,2], index: 3, kind: input, shape index: {}]   ;;  %s844_s4 = inlined_call_operand.<no memory space> [shape: f32[1,1], index: 4, kind: input, shape index: {}]   ;;  %s845_s5 = inlined_call_operand.hbm [shape: f32[2,1,2], index: 5, kind: output, shape index: {}]  }
   0x1   :  { %10 = sst [smem:[#allocation2]] %s844_s4 }
   0x2   :  { %11 = vsyncpa [#allocation4], 0 }
   0x3   :  { %13 = vsyncpa [#allocation4 + $0x1], 0 }
   0x4   :  { %14 = vsyncpa [#allocation5], 0 }
   0x5   :  { %16 = vsyncpa [#allocation5 + $0x1], 0  ;;  %s651_s20 = smov 0   ;;  %s653_s21 = smov 0  }
   0x6   :  { %s655_s22 = smov 0   ;;  %s657_s23 = smov 0  }
   0x7 LB: > { %s672_s4 = sadd.s32 4294967295, %s613_s23   ;;  %s449_s24 = sadd.s32 4294967294, %s613_s23   ;;  %s613_s23 = sphi %s657_s23, %s855_s23   ;;  %s609_s22 = sphi %s655_s22, %s854_s22   ;;  %s605_s21 = sphi %s653_s21, %s853_s21   ;;  %s601_s20 = sphi %s651_s20, %s852_s20  }
   0x8   : > { %s676_s25 = sadd.s32 1, %s613_s23   ;;  %s29_s26 = sadd.s32 1, %s609_s22 }
   0x9   : > { %s26_s27 = ssub.s32 %s613_s23, %s676_s25  ;;  %p36_p0 = scmp.ne.s32.totalorder %s609_s22, %s605_s21 }
   0xa   : > { %p27_p1 = scmp.eq.s32.totalorder %s26_s27, 0  ;;  %p37_p2 = scmp.eq.s32.totalorder %s613_s23, 0 }
   0xb   : > { %p42_p3 = scmp.ne.s32.totalorder %s605_s21, %s601_s20  ;;  %p43_p4 = scmp.eq.s32.totalorder %s672_s4, 0 }
   0xc   : > { %s688_s28 = scalar_select %p27_p1, %s609_s22, %s29_s26  }
   0xd   : > { %p690_p5 = por %p37_p2, %p36_p0  ;;  %p694_p6 = por %p43_p4, %p42_p3 }
   0xe   : > { %p150_p7 = scmp.eq.s32.totalorder %s672_s4, 1  ;;  %p156_p8 = scmp.eq.s32.totalorder %s449_s24, 1 }
   0xf   : > { %p474_p10 = scmp.lt.s32.totalorder %s613_s23, 2  ;;  %s188_s8 = sand.u32 1, %s609_s22  }
  0x10   : > { %p701_p11 = por %p150_p7, %p36_p0  ;;  %p705_p12 = por %p156_p8, %p42_p3 }
  0x11   : > { %s461_s9 = sshll.u32 %s613_s23, 6  ;;  %s452_s10 = sshll.u32 %s188_s8, 6 }
  0x12   : > { %s197_s13 = scalar_lea.hbm %s840_s0, %s461_s9  ;;  %s192_s15 = scalar_lea.vmem [#allocation3], %s452_s10 }
  0x13   : > { %s198_s14 = sshll.u32 %s197_s13, 4  ;;  %s200_s16 = sshll.u32 %s192_s15, 4  ;;  %s199_s14 = int_to_ptr.hbm [resolvable:$true] %s198_s14  ;;  %s201_s16 = int_to_ptr.vmem [resolvable:$true] %s200_s16 }
  0x14   : > { %p716_p13 = pnand %p474_p10, %p690_p5  ;;  %p455_p0 = scmp.ge.s32.totalorder %s613_s23, 1 }
  0x15   : > { %p208_p1 = scmp.lt.s32.totalorder %s613_s23, 3  ;;  %s189_s18 = scalar_lea.sflag [#allocation4], %s188_s8 }
  0x16   : > { %s517_s19 = sshra.s32 %s199_s14, 4  ;;  %p521_p3 = pneg %p716_p13  ;;  %s518_s19 = int_to_ptr.hbm [resolvable:$true] %s517_s19 }
  0x17   : > { %s519_s24 = scalar_lea.hbm %s518_s19, 64  ;;  %s524_s29 = scalar_lea.hbm %s840_s0, 128 }
  0x18   : > { %p520_p2 = scmp.ne.s32.totalorder %s518_s19, %s519_s24  ;;  %p525_p5 = scmp.lt.s32.totalorder %s518_s19, %s840_s0 }
  0x19   : > { %p526_p8 = scmp.lt.s32.totalorder %s524_s29, %s519_s24 }
  0x1a   : > { %p522_p4 = pnand %p521_p3, %p520_p2 }
  0x1b   : > { %p527_p10 = por %p526_p8, %p525_p5 }
  0x1c   : > { %p523_p7 = pneg %p522_p4 }
  0x1e   : > { %p528_p9 = pnand %p527_p10, %p523_p7 }
  0x20   : > { %531 = shalt.err (!%p528_p9)
}
  0x21   : > { %s615_s8 = smov 128   ;;  %s616_s11 = smov 8  }
  0x22   : > { %469 = dma.hbm_to_vmem [thread:$0]  (!%p716_p13), %s199_s14, 1024, %s201_s16, %s189_s18, %s615_s8, %s615_s8, %s616_s11  }
  0x23   : > { %p209_p2 = pnand %p455_p0, %p208_p1 }
  0x24   : > { %s737_s12 = sand.u32 (!%p209_p2), 1, %s605_s21  }
  0x25   : > { %212 = sbr.rel (%p209_p2) target bundleno = 368 (0x170), region = 40  ;;  %s456_s13 = sshll.u32 (!%p209_p2), %s737_s12, 6 }
  0x26   : > { %s215_s15 = scalar_lea.sflag (!%p209_p2), [#allocation4], %s737_s12  ;;  %s741_s19 = scalar_lea.vmem (!%p209_p2), [#allocation3], %s456_s13 }
  0x2a   : > { %592 = dma.done.wait (%p694_p6), %s215_s15, 1024  }
  0x2b   : > { %594 = vsyncadd (%p694_p6), %s215_s15, 4294966272  ;;  %v297_v0 = vld [vmem:[%s841_s1 + $0x38] sm:$0xff]  ;;  %v296_v1 = vld [vmem:[%s841_s1 + $0x30] sm:$0xff]  ;;  %vm260_vm0 = vcmask 523264   ;;  %v617_v8 = vmov 64.0   ;;  %vm324_vm2 = vcmask 326656   ;;  %s379_s14 = scalar_lea.hbm %s845_s5, %s672_s4 }
  0x2c   : > { %309 = vmatpush.msra.mxu0 %v297_v0  ;;  %v295_v2 = vld [vmem:[%s841_s1 + $0x28] sm:$0xff]  ;;  %v245_v3 = vld [vmem:[%s741_s19] sm:$0xff]  ;;  %v247_v5 = vld [vmem:[%s741_s19 + $0x10] sm:$0xff]  ;;  %511 = vrcp.f32 %v617_v8  ;;  %s259_s11 = sld [smem:[#allocation2]]  ;;  %s244_s16 = scalar_lea.vmem [#allocation6], %s737_s12  ;;  %vm368_vm6 = vcmask 8192  }
  0x2d   : > { %v246_v4 = vld [vmem:[%s741_s19 + $0x8] sm:$0xff]  ;;  %v248_v6 = vld [vmem:[%s741_s19 + $0x18] sm:$0xff]  ;;  %v261_v7 = vsel %vm260_vm0, %v245_v3, 0.0  ;;  %v294_v9 = vld [vmem:[%s841_s1 + $0x20] sm:$0xff]  ;;  %v264_v11 = vsel %vm260_vm0, %v247_v5, 0.0  ;;  %s381_s17 = sshll.u32 %s244_s16, 4  ;;  %s382_s17 = int_to_ptr.vmem [resolvable:$true] %s381_s17 }
  0x2e   : > { %310 = vmatpush.msra.mxu0 %v296_v1  ;;  %v262_v10 = vsel %vm260_vm0, %v246_v4, 0.0  ;;  %v249_v12 = vld [vmem:[%s741_s19 + $0x20] sm:$0xff]  ;;  %v293_v15 = vld [vmem:[%s841_s1 + $0x18] sm:$0xff]  ;;  %v266_v16 = vsel %vm260_vm0, %v248_v6, 0.0  ;;  %v250_v17 = vld [vmem:[%s741_s19 + $0x28] sm:$0xff]  ;;  %s371_s4 = scalar_lea.sflag [#allocation5], %s737_s12 }
  0x2f   : > { %v263_v13 = vadd.f32 %v262_v10, %v261_v7  ;;  %v258_v14 = vld [vmem:[%s843_s3 + $0x20] sm:$0xff]  ;;  %v292_v19 = vld [vmem:[%s841_s1 + $0x10] sm:$0xff]  ;;  %v268_v20 = vsel %vm260_vm0, %v249_v12, 0.0  ;;  %v291_v24 = vld [vmem:[%s841_s1 + $0x8] sm:$0xff]  ;;  %v270_v25 = vsel %vm260_vm0, %v250_v17, 0.0  ;;  %s567_s27 = scalar_lea.hbm %s845_s5, 2 }
  0x30   : > { %311 = vmatpush.msra.mxu0 %v295_v2  ;;  %339 = vmatpush.msra.mxu1 %v258_v14  ;;  %v251_v22 = vld [vmem:[%s741_s19 + $0x30] sm:$0xff]  ;;  %v252_v26 = vld [vmem:[%s741_s19 + $0x38] sm:$0xff]  ;;  %v290_v28 = vld [vmem:[%s841_s1] sm:$0xff]  ;;  %s383_s19 = sshll.u32 %s379_s14, 4  ;;  %s384_s19 = int_to_ptr.hbm [resolvable:$true] %s383_s19 }
  0x31   : > { %v265_v18 = vadd.f32 %v264_v11, %v263_v13  ;;  %v272_v29 = vsel %vm260_vm0, %v251_v22, 0.0  ;;  %v274_v32 = vsel %vm260_vm0, %v252_v26, 0.0  ;;  %v257_v46 = vld [vmem:[%s843_s3 + $0x18] sm:$0xff]  ;;  %v256_v47 = vld [vmem:[%s843_s3 + $0x10] sm:$0xff]  ;;  %v255_v48 = vld [vmem:[%s843_s3 + $0x8] sm:$0xff]  ;;  %s561_s18 = sshra.s32 %s384_s19, 4  ;;  %s562_s18 = int_to_ptr.hbm [resolvable:$true] %s561_s18 }
  0x32   : > { %312 = vmatpush.msra.mxu0 %v294_v9  ;;  %v512_v21 = vpop.eup %511  ;;  %340 = vmatpush.msra.mxu1 %v257_v46  ;;  %v254_v49 = vld [vmem:[%s843_s3] sm:$0xff]  ;;  %v323_v55 = vstv %s259_s11  ;;  %s563_s24 = scalar_lea.hbm %s562_s18, 1  ;;  %p568_p0 = scmp.lt.s32.totalorder %s562_s18, %s845_s5 }
  0x33   : > { %v267_v23 = vadd.f32 %v266_v16, %v265_v18  ;;  %v283_v30 = vmul.f32 64.0, %v512_v21  ;;  %vm287_vm1 = vweird.f32 %v512_v21  ;;  %v253_v50 = vld [vmem:[%s842_s2] sm:$0x1]  ;;  %p564_p6 = scmp.ne.s32.totalorder %s562_s18, %s563_s24  ;;  %p569_p1 = scmp.lt.s32.totalorder %s567_s27, %s563_s24 }
  0x34   : > { %313 = vmatpush.msra.mxu0 %v293_v15  ;;  %341 = vmatpush.msra.mxu1 %v256_v47 }
  0x35   : > { %v269_v27 = vadd.f32 %v268_v20, %v267_v23  ;;  %v284_v34 = vsub.f32 1.0, %v283_v30  ;;  %p565_p9 = pnand %p564_p6, %p701_p11  ;;  %p570_p3 = por %p569_p1, %p568_p0 }
  0x36   : > { %314 = vmatpush.msra.mxu0 %v292_v19  ;;  %342 = vmatpush.msra.mxu1 %v255_v48 }
  0x37   : > { %v271_v31 = vadd.f32 %v270_v25, %v269_v27  ;;  %v285_v37 = vmul.f32 %v512_v21, %v284_v34  ;;  %p566_p13 = pneg %p565_p9 }
  0x38   : > { %315 = vmatpush.msra.mxu0 %v291_v24  ;;  %343 = vmatpush.msra.mxu1 %v254_v49 }
  0x39   : > { %v273_v33 = vadd.f32 %v272_v29, %v271_v31  ;;  %v286_v40 = vadd.f32 %v512_v21, %v285_v37  ;;  %p571_p4 = pnand %p570_p3, %p566_p13 }
  0x3a   : > { %316 = vmatpush.msra.mxu0 %v290_v28 }
  0x3b   : > { %v275_v35 = vadd.f32 %v274_v32, %v273_v33  ;;  %v288_v43 = vsel %vm287_vm1, %v512_v21, %v286_v40 }
  0x3d   : > { %v276_v36 = vrot.slane %v275_v35, 4 }
  0x3f   : > { %v277_v38 = vadd.f32 %v276_v36, %v275_v35 }
  0x41   : > { %v278_v39 = vrot.slane %v277_v38, 2 }
  0x43   : > { %v279_v41 = vadd.f32 %v278_v39, %v277_v38 }
  0x45   : > { %v280_v42 = vrot.slane %v279_v41, 1 }
  0x47   : > { %v281_v44 = vadd.f32 %v280_v42, %v279_v41 }
  0x49   : > { %v289_v45 = vmul.f32 %v288_v43, %v281_v44 }
  0x4b   : > { %457 = vmatmul.msk.f32.vlgmr.msra.gmra.mxu0 %vm260_vm0, %v289_v45 }
  0xc8   : > { %v318_v51 = vpop.f32.mrf.mxu0 }
  0xc9   : > { %v319_v52 = vadd.f32 %v318_v51, %v253_v50 }
  0xcb   : > { %v321_v53 = vmul.f32 0.01, %v319_v52 }
  0xcd   : > { %v322_v54 = vmax.f32 %v319_v52, %v321_v53 }
  0xcf   : > { %458 = vmatmul.msk.f32.vlgmr.msra.gmra.mxu1 %vm324_vm2, %v322_v54 }
 0x14c   : > { %v345_v56 = vpop.f32.mrf.mxu1 }
 0x14d   : > { %v346_v57 = vadd.f32 %v345_v56, %v323_v55 }
 0x14f   : > { %v348_v58 = vsub.f32 0.0, %v346_v57 }
 0x151   : > { %v349_v59 = vmul.f32 1.442695, %v348_v58 }
 0x153   : > { %513 = vpow2.f32 %v349_v59 }
 0x159   : > { %v514_v60 = vpop.eup %513 }
 0x15a   : > { %v351_v61 = vadd.f32 1.0, %v514_v60 }
 0x15c   : > { %515 = vrcp.f32 %v351_v61  ;;  %v363_v1 = vand.u32 2147483648, %v351_v61  ;;  %v361_v3 = vand.u32 2147483647, %v351_v61  ;;  %vm357_vm4 = vweird.f32 %v351_v61 }
 0x15e   : > { %v364_v5 = vor.u32 1.1754944e-38, %v363_v1  ;;  %vm362_vm7 = vcmp.eq.f32.partialorder %v361_v3, 8.507059e+37 }
 0x162   : > { %v516_v62 = vpop.eup %515 }
 0x163   : > { %v353_v63 = vmul.f32 %v516_v62, %v351_v61  ;;  %vm358_vm3 = vweird.f32 %v516_v62 }
 0x164   : > { %vm359_vm5 = vmor %vm357_vm4, %vm358_vm3 }
 0x165   : > { %v354_v0 = vsub.f32 1.0, %v353_v63 }
 0x167   : > { %v355_v2 = vmul.f32 %v516_v62, %v354_v0 }
 0x169   : > { %v356_v4 = vadd.f32 %v516_v62, %v355_v2 }
 0x16b   : > { %v360_v6 = vsel %vm359_vm5, %v516_v62, %v356_v4 }
 0x16c   : > { %v365_v7 = vsel %vm362_vm7, %v364_v5, %v360_v6 }
 0x16d   : > { %369 = vst.msk [vmem:[%s244_s16] sm:$0x1] %vm368_vm6, %v365_v7 }
 0x16e   : > { %574 = shalt.err (!%p571_p4)
}
 0x16f   : > { %464 = dma.vmem_to_hbm [thread:$0]  (%p701_p11), %s382_s17, 16, %s384_s19, %s371_s4  }
 0x170 PF: > { %s395_s12 = sand.u32 1, %s601_s20   ;;  %p851_p7 = scmp.ge.s32.totalorder %s613_s23, 2 }
 0x171   : > { %s396_s10 = scalar_lea.sflag [#allocation5], %s395_s12 }
 0x172   : > { %p471_p5 = pnand %p851_p7, %p705_p12 }
 0x174   : > { %p472_p8 = pneg %p471_p5 }
 0x176   : > { %596 = dma.done.wait (%p472_p8), %s396_s10, 16  }
 0x177   : > { %598 = vsyncadd (%p472_p8), %s396_s10, 4294967280  ;;  %p19_p10 = scmp.ge.s32.totalorder %s676_s25, 4   ;;  %s852_s20 = smov %s605_s21 }
 0x178   : > { %s853_s21 = smov %s609_s22  ;;  %s854_s22 = smov %s688_s28 }
 0x179   : > { %s855_s23 = smov %s676_s25  ;;  %21 = sbr.rel (!%p19_p10) target bundleno = 7 (0x7), region = 85 }
 0x17e   :  { %401 = vsyncpa [#allocation4], 1 }
 0x17f   :  { %403 = vsyncpa [#allocation4 + $0x1], 1 }
 0x180   :  { %404 = vsyncpa [#allocation5], 1 }
 0x181   :  { %406 = vsyncpa [#allocation5 + $0x1], 1 }

</bundles_post_ra>
